<compile_context>
chip_gen: v7x
topology: tpu7x:2x2x1
jax: 0.10.0
libtpu: 0.0.40
codegen_flags: <defaults>
</compile_context>

<pallas_src>
import jax
import jax.numpy as jnp
from jax.experimental import pallas as pl
from jax.experimental.pallas import tpu as pltpu


def _tagging_kernel(x_ref, adj_ref,
                    w_enc_ref, b_enc_ref,
                    w_gcn_ref, w_self_ref,
                    w_head_ref, b_head_ref,
                    out_ref):
    # x_ref:   (Bb, D, E) bf16 pooled utterance vectors (word mean-pool done in wrapper)
    # adj_ref: (Bb, D, D) f32 row-normalised dialogue adjacency (precomputed in wrapper)
    Bb, D, E = x_ref.shape
    M = Bb * D

    # Collapse B*D into a single MXU row dimension for all dense matmuls.
    x = x_ref[...].astype(jnp.float32).reshape(M, E)

    # --- utterance encoder: linear + ReLU ---
    h = jnp.dot(x, w_enc_ref[...], preferred_element_type=jnp.float32) + b_enc_ref[...]
    h = jnp.maximum(h, 0.0)                                              # (M, H)

    # --- dialogue graph convolution (RGCN-style: neighbour message + self transform) ---
    hw = jnp.dot(h, w_gcn_ref[...], preferred_element_type=jnp.float32)  # (M, H)
    msg = jnp.einsum('bij,bjh->bih', adj_ref[...],
                     hw.reshape(Bb, D, -1),
                     preferred_element_type=jnp.float32)                 # (Bb, D, H)
    g = jnp.maximum(msg.reshape(M, -1)
                    + jnp.dot(h, w_self_ref[...], preferred_element_type=jnp.float32),
                    0.0)                                                 # (M, H)

    # --- fused decoder heads (sentiment | act), lane-padded -> one unmasked lane-dense store ---
    out = jnp.dot(g, w_head_ref[...], preferred_element_type=jnp.float32) + b_head_ref[...]
    out_ref[...] = out.reshape(Bb, D, -1).astype(out_ref.dtype)


def tagging_agent_forward(word_ids, word_mask, adj, params, *, block_b=128):
    """word_ids: int32 [B, D, T]; word_mask: [B, D, T] (1 = real word); adj: [B, D, D]."""
    B, D, T = word_ids.shape
    E = params["embedding"].shape[1]
    H = params["w_enc"].shape[1]
    S = params["w_sent"].shape[1]
    A = params["w_act"].shape[1]

    # --- XLA glue: embedding gather fused with masked mean-pool over words ---
    emb = params["embedding"][word_ids]                                   # (B, D, T, E)
    m = word_mask.astype(jnp.float32)[..., None]                          # (B, D, T, 1)
    pooled = (emb * m).sum(axis=2) / jnp.maximum(m.sum(axis=2), 1.0)      # (B, D, E)
    pooled = pooled.astype(jnp.bfloat16)                                  # halve DMA bytes

    # --- precompute row-normalised adjacency once (constant per dialogue) ---
    adj_f = adj.astype(jnp.float32)
    deg = jnp.sum(adj_f, axis=-1, keepdims=True)
    adj_n = adj_f / jnp.maximum(deg, 1.0)

    # --- fuse the two decoder heads into one lane-dense (H, >=128) weight ---
    n_out = S + A
    Np = max(128, ((n_out + 127) // 128) * 128)
    w_head = jnp.zeros((H, Np), jnp.float32)
    w_head = w_head.at[:, :S].set(params["w_sent"]).at[:, S:S + A].set(params["w_act"])
    b_head = jnp.zeros((1, Np), jnp.float32)
    b_head = b_head.at[:, :S].set(params["b_sent"]).at[:, S:S + A].set(params["b_act"])

    # --- batch many dialogues per grid step to amortise per-step overhead ---
    Bb = min(block_b, B)
    n_blocks = pl.cdiv(B, Bb)
    B_pad = n_blocks * Bb
    if B_pad != B:
        pooled = jnp.pad(pooled, ((0, B_pad - B), (0, 0), (0, 0)))
        adj_n = jnp.pad(adj_n, ((0, B_pad - B), (0, 0), (0, 0)))

    def full(shp):
        return pl.BlockSpec(shp, lambda b: (0,) * len(shp))   # resident weights

    out = pl.pallas_call(
        _tagging_kernel,
        out_shape=jax.ShapeDtypeStruct((B_pad, D, Np), jnp.float32),
        grid=(n_blocks,),
        in_specs=[
            pl.BlockSpec((Bb, D, E), lambda b: (b, 0, 0)),     # pooled utterances (bf16)
            pl.BlockSpec((Bb, D, D), lambda b: (b, 0, 0)),     # normalised adjacency
            full((E, H)),    # w_enc
            full((1, H)),    # b_enc
            full((H, H)),    # w_gcn
            full((H, H)),    # w_self
            full((H, Np)),   # fused head weight (sent|act, lane-padded)
            full((1, Np)),   # fused head bias
        ],
        out_specs=pl.BlockSpec((Bb, D, Np), lambda b: (b, 0, 0)),
        compiler_params=pltpu.CompilerParams(
            dimension_semantics=("parallel",)),
    )(pooled, adj_n,
      params["w_enc"], params["b_enc"],
      params["w_gcn"], params["w_self"],
      w_head, b_head)

    sent_logits = out[:B, :, :S]
    act_logits = out[:B, :, S:S + A]
    # Mirror the PyTorch API: decoder returns lists of per-stack predictions.
    return [sent_logits], [act_logits]


def init_params(key, vocab_size, embedding_dim, hidden_dim, n_sent, n_act):
    ks = jax.random.split(key, 8)
    scale = 0.1
    return {
        "embedding": scale * jax.random.normal(ks[0], (vocab_size, embedding_dim), jnp.float32),
        "w_enc":  scale * jax.random.normal(ks[1], (embedding_dim, hidden_dim), jnp.float32),
        "b_enc":  jnp.zeros((1, hidden_dim), jnp.float32),
        "w_gcn":  scale * jax.random.normal(ks[2], (hidden_dim, hidden_dim), jnp.float32),
        "w_self": scale * jax.random.normal(ks[3], (hidden_dim, hidden_dim), jnp.float32),
        "w_sent": scale * jax.random.normal(ks[4], (hidden_dim, n_sent), jnp.float32),
        "b_sent": jnp.zeros((1, n_sent), jnp.float32),
        "w_act":  scale * jax.random.normal(ks[5], (hidden_dim, n_act), jnp.float32),
        "b_act":  jnp.zeros((1, n_act), jnp.float32),
    }


if __name__ == "__main__":
    key = jax.random.PRNGKey(0)
    B, D, T = 2, 8, 16          # dialogues, turns per dialogue, words per turn
    vocab_size, E, H = 50, 32, 32
    n_sent, n_act = 8, 8

    k_ids, k_adj, k_len, k_par = jax.random.split(key, 4)
    word_ids = jax.random.randint(k_ids, (B, D, T), 0, vocab_size, dtype=jnp.int32)

    # Variable turn lengths -> padding mask for the masked mean-pool.
    turn_len = jax.random.randint(k_len, (B, D), 4, T + 1, dtype=jnp.int32)
    word_mask = (jnp.arange(T)[None, None, :] < turn_len[:, :, None]).astype(jnp.float32)

    # Symmetric-ish 0/1 dialogue adjacency with self loops.
    adj_raw = (jax.random.uniform(k_adj, (B, D, D)) > 0.5).astype(jnp.float32)
    eye = jnp.eye(D, dtype=jnp.float32)[None]
    adj = jnp.clip(adj_raw + eye, 0.0, 1.0)

    params = init_params(k_par, vocab_size, E, H, n_sent, n_act)

    pred_sents, pred_acts = tagging_agent_forward(word_ids, word_mask, adj, params)
    jax.block_until_ready(pred_sents[-1])
    jax.block_until_ready(pred_acts[-1])

    assert pred_sents[-1].shape == (B, D, n_sent)
    assert pred_acts[-1].shape == (B, D, n_act)
    print("KERNEL_OK")
</pallas_src>

<mosaic_0001>
module attributes {stable_mosaic.version = 11 : i64} {
  func.func @_tagging_kernel(%arg0: i32, %arg1: memref<2x8x32xbf16, #tpu.memory_space<vmem>>, %arg2: memref<2x8x8xf32, #tpu.memory_space<vmem>>, %arg3: memref<32x32xf32, #tpu.memory_space<vmem>>, %arg4: memref<1x32xf32, #tpu.memory_space<vmem>>, %arg5: memref<32x32xf32, #tpu.memory_space<vmem>>, %arg6: memref<32x32xf32, #tpu.memory_space<vmem>>, %arg7: memref<32x128xf32, #tpu.memory_space<vmem>>, %arg8: memref<1x128xf32, #tpu.memory_space<vmem>>, %arg9: memref<2x8x128xf32, #tpu.memory_space<vmem>>) attributes {dimension_semantics = [#tpu.dimension_semantics<parallel>], iteration_bounds = array<i64: 1>, scalar_prefetch = 0 : i64, scratch_operands = 0 : i64, tpu.core_type = #tpu.core_type<tc>, window_params = [{transform_indices = @transform_0, window_bounds = array<i64: 2, 8, 32>}, {transform_indices = @transform_1, window_bounds = array<i64: 2, 8, 8>}, {pipeline_mode = #tpu.pipeline_mode<synchronous>, transform_indices = @transform_2, window_bounds = array<i64: 32, 32>}, {pipeline_mode = #tpu.pipeline_mode<synchronous>, transform_indices = @transform_3, window_bounds = array<i64: 1, 32>}, {pipeline_mode = #tpu.pipeline_mode<synchronous>, transform_indices = @transform_4, window_bounds = array<i64: 32, 32>}, {pipeline_mode = #tpu.pipeline_mode<synchronous>, transform_indices = @transform_5, window_bounds = array<i64: 32, 32>}, {pipeline_mode = #tpu.pipeline_mode<synchronous>, transform_indices = @transform_6, window_bounds = array<i64: 32, 128>}, {pipeline_mode = #tpu.pipeline_mode<synchronous>, transform_indices = @transform_7, window_bounds = array<i64: 1, 128>}, {transform_indices = @transform_8, window_bounds = array<i64: 2, 8, 128>}]} {
    %c0 = arith.constant 0 : index
    %c0_0 = arith.constant 0 : index
    %c0_1 = arith.constant 0 : index
    %0 = vector.load %arg1[%c0, %c0_0, %c0_1] : memref<2x8x32xbf16, #tpu.memory_space<vmem>>, vector<2x8x32xbf16>
    %1 = arith.extf %0 : vector<2x8x32xbf16> to vector<2x8x32xf32>
    %2 = vector.shape_cast %1 : vector<2x8x32xf32> to vector<16x32xf32>
    %c0_2 = arith.constant 0 : index
    %c0_3 = arith.constant 0 : index
    %3 = vector.load %arg3[%c0_2, %c0_3] : memref<32x32xf32, #tpu.memory_space<vmem>>, vector<32x32xf32>
    %cst = arith.constant dense<0.000000e+00> : vector<16x32xf32>
    %4 = tpu.matmul %2, %3, %cst {dimension_numbers = #tpu.dot_dimension_numbers<[1], [0], [0], [1], [0, 0, 1, 1], [], []>} : vector<16x32xf32>, vector<32x32xf32>, vector<16x32xf32> -> vector<16x32xf32>
    %c0_4 = arith.constant 0 : index
    %c0_5 = arith.constant 0 : index
    %5 = vector.load %arg4[%c0_4, %c0_5] : memref<1x32xf32, #tpu.memory_space<vmem>>, vector<1x32xf32>
    %6 = vector.broadcast %5 : vector<1x32xf32> to vector<16x32xf32>
    %7 = arith.addf %4, %6 : vector<16x32xf32>
    %cst_6 = arith.constant 0.000000e+00 : f32
    %8 = vector.broadcast %cst_6 : f32 to vector<16x32xf32>
    %9 = arith.maximumf %7, %8 : vector<16x32xf32>
    %c0_7 = arith.constant 0 : index
    %c0_8 = arith.constant 0 : index
    %10 = vector.load %arg5[%c0_7, %c0_8] : memref<32x32xf32, #tpu.memory_space<vmem>>, vector<32x32xf32>
    %cst_9 = arith.constant dense<0.000000e+00> : vector<16x32xf32>
    %11 = tpu.matmul %9, %10, %cst_9 {dimension_numbers = #tpu.dot_dimension_numbers<[1], [0], [0], [1], [0, 0, 1, 1], [], []>} : vector<16x32xf32>, vector<32x32xf32>, vector<16x32xf32> -> vector<16x32xf32>
    %c0_10 = arith.constant 0 : index
    %c0_11 = arith.constant 0 : index
    %c0_12 = arith.constant 0 : index
    %12 = vector.load %arg2[%c0_10, %c0_11, %c0_12] : memref<2x8x8xf32, #tpu.memory_space<vmem>>, vector<2x8x8xf32>
    %13 = vector.shape_cast %11 : vector<16x32xf32> to vector<2x8x32xf32>
    "tpu.trace_start"() <{level = 10 : i32, message = "bij,bjh->bih"}> : () -> ()
    %cst_13 = arith.constant dense<0.000000e+00> : vector<2x8x32xf32>
    %14 = tpu.matmul %12, %13, %cst_13 {dimension_numbers = #tpu.dot_dimension_numbers<[2], [1], [1], [2], [0, 0, 0, 1, 1, 2], [0], [0]>} : vector<2x8x8xf32>, vector<2x8x32xf32>, vector<2x8x32xf32> -> vector<2x8x32xf32>
    "tpu.trace_stop"() : () -> ()
    %15 = vector.shape_cast %14 : vector<2x8x32xf32> to vector<16x32xf32>
    %c0_14 = arith.constant 0 : index
    %c0_15 = arith.constant 0 : index
    %16 = vector.load %arg6[%c0_14, %c0_15] : memref<32x32xf32, #tpu.memory_space<vmem>>, vector<32x32xf32>
    %cst_16 = arith.constant dense<0.000000e+00> : vector<16x32xf32>
    %17 = tpu.matmul %9, %16, %cst_16 {dimension_numbers = #tpu.dot_dimension_numbers<[1], [0], [0], [1], [0, 0, 1, 1], [], []>} : vector<16x32xf32>, vector<32x32xf32>, vector<16x32xf32> -> vector<16x32xf32>
    %18 = arith.addf %15, %17 : vector<16x32xf32>
    %cst_17 = arith.constant 0.000000e+00 : f32
    %19 = vector.broadcast %cst_17 : f32 to vector<16x32xf32>
    %20 = arith.maximumf %18, %19 : vector<16x32xf32>
    %c0_18 = arith.constant 0 : index
    %c0_19 = arith.constant 0 : index
    %21 = vector.load %arg7[%c0_18, %c0_19] : memref<32x128xf32, #tpu.memory_space<vmem>>, vector<32x128xf32>
    %cst_20 = arith.constant dense<0.000000e+00> : vector<16x128xf32>
    %22 = tpu.matmul %20, %21, %cst_20 {dimension_numbers = #tpu.dot_dimension_numbers<[1], [0], [0], [1], [0, 0, 1, 1], [], []>} : vector<16x32xf32>, vector<32x128xf32>, vector<16x128xf32> -> vector<16x128xf32>
    %c0_21 = arith.constant 0 : index
    %c0_22 = arith.constant 0 : index
    %23 = vector.load %arg8[%c0_21, %c0_22] : memref<1x128xf32, #tpu.memory_space<vmem>>, vector<1x128xf32>
    %24 = vector.broadcast %23 : vector<1x128xf32> to vector<16x128xf32>
    %25 = arith.addf %22, %24 : vector<16x128xf32>
    %26 = vector.shape_cast %25 : vector<16x128xf32> to vector<2x8x128xf32>
    %c0_23 = arith.constant 0 : index
    %c0_24 = arith.constant 0 : index
    %c0_25 = arith.constant 0 : index
    %27 = vector.load %arg9[%c0_23, %c0_24, %c0_25] : memref<2x8x128xf32, #tpu.memory_space<vmem>>, vector<2x8x128xf32>
    tpu.vector_store %arg9[%c0_23, %c0_24, %c0_25], %26 {strides = array<i32>} : memref<2x8x128xf32, #tpu.memory_space<vmem>>, vector<2x8x128xf32>,
    return
  }
  func.func @transform_0(%arg0: i32) -> (i32, i32, i32) {
    %c0_i32 = arith.constant 0 : i32
    %c0_i32_0 = arith.constant 0 : i32
    %c0_i32_1 = arith.constant 0 : i32
    return %arg0, %c0_i32, %c0_i32_0 : i32, i32, i32
  }
  func.func @transform_1(%arg0: i32) -> (i32, i32, i32) {
    %c0_i32 = arith.constant 0 : i32
    %c0_i32_0 = arith.constant 0 : i32
    %c0_i32_1 = arith.constant 0 : i32
    return %arg0, %c0_i32, %c0_i32_0 : i32, i32, i32
  }
  func.func @transform_2(%arg0: i32) -> (i32, i32) {
    %c0_i32 = arith.constant 0 : i32
    %c0_i32_0 = arith.constant 0 : i32
    %c0_i32_1 = arith.constant 0 : i32
    return %c0_i32, %c0_i32_0 : i32, i32
  }
  func.func @transform_3(%arg0: i32) -> (i32, i32) {
    %c0_i32 = arith.constant 0 : i32
    %c0_i32_0 = arith.constant 0 : i32
    %c0_i32_1 = arith.constant 0 : i32
    return %c0_i32, %c0_i32_0 : i32, i32
  }
  func.func @transform_4(%arg0: i32) -> (i32, i32) {
    %c0_i32 = arith.constant 0 : i32
    %c0_i32_0 = arith.constant 0 : i32
    %c0_i32_1 = arith.constant 0 : i32
    return %c0_i32, %c0_i32_0 : i32, i32
  }
  func.func @transform_5(%arg0: i32) -> (i32, i32) {
    %c0_i32 = arith.constant 0 : i32
    %c0_i32_0 = arith.constant 0 : i32
    %c0_i32_1 = arith.constant 0 : i32
    return %c0_i32, %c0_i32_0 : i32, i32
  }
  func.func @transform_6(%arg0: i32) -> (i32, i32) {
    %c0_i32 = arith.constant 0 : i32
    %c0_i32_0 = arith.constant 0 : i32
    %c0_i32_1 = arith.constant 0 : i32
    return %c0_i32, %c0_i32_0 : i32, i32
  }
  func.func @transform_7(%arg0: i32) -> (i32, i32) {
    %c0_i32 = arith.constant 0 : i32
    %c0_i32_0 = arith.constant 0 : i32
    %c0_i32_1 = arith.constant 0 : i32
    return %c0_i32, %c0_i32_0 : i32, i32
  }
  func.func @transform_8(%arg0: i32) -> (i32, i32, i32) {
    %c0_i32 = arith.constant 0 : i32
    %c0_i32_0 = arith.constant 0 : i32
    %c0_i32_1 = arith.constant 0 : i32
    return %arg0, %c0_i32, %c0_i32_0 : i32, i32, i32
  }
}

</mosaic_0001>

<bundles_post_ra>
// kernel: tpu_custom_call.1
= control target key start
LH: loop header
LB: loop body
LE: loop exit
PB: predicated region body
PF: predicated region fallthrough
CT: control target
= control target key end

     0   :  { %13 = vsyncpa [#allocation3], 0  ;;  %s1123_s0 = inlined_call_operand.hbm [shape: bf16[2,8,32], index: 0, kind: input, shape index: {}]   ;;  %s1124_s1 = inlined_call_operand.hbm [shape: f32[2,8,8], index: 1, kind: input, shape index: {}]   ;;  %s1125_s2 = inlined_call_operand.hbm [shape: f32[32,32], index: 2, kind: input, shape index: {}]   ;;  %s1126_s3 = inlined_call_operand.vmem [shape: f32[1,32], index: 3, kind: input, shape index: {}]   ;;  %s1127_s4 = inlined_call_operand.hbm [shape: f32[32,32], index: 4, kind: input, shape index: {}]   ;;  %s1128_s5 = inlined_call_operand.hbm [shape: f32[32,32], index: 5, kind: input, shape index: {}]   ;;  %s1129_s6 = inlined_call_operand.hbm [shape: f32[32,128], index: 6, kind: input, shape index: {}]   ;;  %s1130_s7 = inlined_call_operand.vmem [shape: f32[1,128], index: 7, kind: input, shape index: {}]   ;;  %s1131_s8 = inlined_call_operand.hbm [shape: f32[2,8,128], index: 8, kind: output, shape index: {}]  }
   0x1   :  { %14 = vsyncpa [#allocation6], 0 }
   0x2   :  { %15 = vsyncpa [#allocation9], 0 }
   0x3   :  { %16 = vsyncpa [#allocation12], 0 }
   0x4   :  { %17 = vsyncpa [#allocation4], 0  ;;  %s949_s27 = smov [#allocation5]   ;;  %s785_s9 = scalar_lea.hbm %s1124_s1, 256 }
   0x5   :  { %s35_s28 = sshll.u32 %s949_s27, 4  ;;  %p786_p0 = scmp.ne.s32.totalorder %s1124_s1, %s785_s9  ;;  %s36_s28 = int_to_ptr.vmem [resolvable:$true] %s35_s28 }
   0x6   :  { %p789_p1 = scmp.lt.u32.totalorder %s785_s9, %s1124_s1 }
   0x8   :  { %p791_p2 = pnand %p789_p1, %p786_p0 }
   0xa   :  { %794 = shalt.err (!%p791_p2)
}
   0xb   :  { %s795_s14 = scalar_lea.vmem %s36_s28, 256  ;;  %p800_p4 = scmp.lt.s32.totalorder %s36_s28, %s36_s28 }
   0xc   :  { %p796_p3 = scmp.ne.s32.totalorder %s36_s28, %s795_s14  ;;  %p801_p5 = scmp.lt.s32.totalorder %s795_s14, %s795_s14 }
   0xe   :  { %p802_p6 = por %p801_p5, %p800_p4 }
  0x10   :  { %p803_p7 = pnand %p802_p6, %p796_p3 }
  0x12   :  { %806 = shalt.err (!%p803_p7)
}
  0x13   :  { %s950_s15 = smov 128   ;;  %s951_s16 = smov 8  }
  0x14   :  { %41 = dma.hbm_to_vmem [thread:$0]  %s1124_s1, 256, %s36_s28, [#allocation6], %s950_s15, %s950_s15, %s951_s16  }
  0x15   :  { %s952_s19 = smov [#allocation8]   ;;  %s953_s21 = smov [#allocation2]  }
  0x16   :  { %s61_s20 = sshll.u32 %s952_s19, 4  ;;  %s23_s22 = sshll.u32 %s953_s21, 4  ;;  %s62_s20 = int_to_ptr.vmem [resolvable:$true] %s61_s20  ;;  %s24_s22 = int_to_ptr.vmem [resolvable:$true] %s23_s22 }
  0x17   :  { %s807_s25 = scalar_lea.hbm %s1127_s4, 512 }
  0x18   :  { %p808_p8 = scmp.ne.s32.totalorder %s1127_s4, %s807_s25  ;;  %p811_p9 = scmp.lt.u32.totalorder %s807_s25, %s1127_s4 }
  0x1a   :  { %p813_p10 = pnand %p811_p9, %p808_p8 }
  0x1c   :  { %816 = shalt.err (!%p813_p10)
}
  0x1d   :  { %s817_s1 = scalar_lea.vmem %s62_s20, 512  ;;  %p822_p12 = scmp.lt.s32.totalorder %s62_s20, %s62_s20 }
  0x1e   :  { %p818_p11 = scmp.ne.s32.totalorder %s62_s20, %s817_s1  ;;  %p823_p13 = scmp.lt.s32.totalorder %s817_s1, %s817_s1 }
  0x20   :  { %p824_p0 = por %p823_p13, %p822_p12 }
  0x22   :  { %p825_p1 = pnand %p824_p0, %p818_p11 }
  0x24   :  { %828 = shalt.err (!%p825_p1)
}
  0x25   :  { %67 = dma.hbm_to_vmem [thread:$0]  %s1127_s4, 512, %s62_s20, [#allocation9], %s950_s15, %s950_s15, %s951_s16  }
  0x26   :  { %s829_s12 = scalar_lea.hbm %s1123_s0, 128 }
  0x27   :  { %p830_p2 = scmp.ne.s32.totalorder %s1123_s0, %s829_s12  ;;  %p833_p3 = scmp.lt.u32.totalorder %s829_s12, %s1123_s0 }
  0x29   :  { %p835_p4 = pnand %p833_p3, %p830_p2 }
  0x2b   :  { %838 = shalt.err (!%p835_p4)
}
  0x2c   :  { %s839_s19 = scalar_lea.vmem %s24_s22, 128  ;;  %p844_p6 = scmp.lt.s32.totalorder %s24_s22, %s24_s22 }
  0x2d   :  { %p840_p5 = scmp.ne.s32.totalorder %s24_s22, %s839_s19  ;;  %p845_p7 = scmp.lt.s32.totalorder %s839_s19, %s839_s19 }
  0x2f   :  { %p846_p8 = por %p845_p7, %p844_p6 }
  0x31   :  { %p847_p9 = pnand %p846_p8, %p840_p5 }
  0x33   :  { %850 = shalt.err (!%p847_p9)
}
  0x34   :  { %s954_s4 = smov 64   ;;  %s955_s20 = smov 4  }
  0x35   :  { %29 = dma.hbm_to_vmem [thread:$0]  %s1123_s0, 128, %s24_s22, [#allocation3], %s954_s4, %s954_s4, %s955_s20  }
  0x36   :  { %s956_s24 = smov [#allocation7]   ;;  %s957_s26 = smov [#allocation10]  }
  0x37   :  { %s47_s25 = sshll.u32 %s956_s24, 4  ;;  %s73_s27 = sshll.u32 %s957_s26, 4  ;;  %s48_s25 = int_to_ptr.vmem [resolvable:$true] %s47_s25  ;;  %s74_s27 = int_to_ptr.vmem [resolvable:$true] %s73_s27 }
  0x38   :  { %s851_s1 = scalar_lea.hbm %s1125_s2, 512 }
  0x39   :  { %p852_p10 = scmp.ne.s32.totalorder %s1125_s2, %s851_s1  ;;  %p855_p11 = scmp.lt.u32.totalorder %s851_s1, %s1125_s2 }
  0x3b   :  { %p857_p12 = pnand %p855_p11, %p852_p10 }
  0x3d   :  { %860 = shalt.err (!%p857_p12)
}
  0x3e   :  { %s861_s0 = scalar_lea.vmem %s48_s25, 512  ;;  %p866_p0 = scmp.lt.s32.totalorder %s48_s25, %s48_s25 }
  0x3f   :  { %p862_p13 = scmp.ne.s32.totalorder %s48_s25, %s861_s0  ;;  %p867_p1 = scmp.lt.s32.totalorder %s861_s0, %s861_s0 }
  0x41   :  { %p868_p2 = por %p867_p1, %p866_p0 }
  0x43   :  { %p869_p3 = pnand %p868_p2, %p862_p13 }
  0x45   :  { %872 = shalt.err (!%p869_p3)
}
  0x46   :  { %53 = dma.hbm_to_vmem [thread:$0]  %s1125_s2, 512, %s48_s25, [#allocation6], %s950_s15, %s950_s15, %s951_s16  }
  0x47   :  { %s873_s17 = scalar_lea.hbm %s1128_s5, 512 }
  0x48   :  { %p874_p4 = scmp.ne.s32.totalorder %s1128_s5, %s873_s17  ;;  %p877_p5 = scmp.lt.u32.totalorder %s873_s17, %s1128_s5 }
  0x4a   :  { %p879_p6 = pnand %p877_p5, %p874_p4 }
  0x4c   :  { %882 = shalt.err (!%p879_p6)
}
  0x4d   :  { %s883_s21 = scalar_lea.vmem %s74_s27, 512  ;;  %p888_p8 = scmp.lt.s32.totalorder %s74_s27, %s74_s27 }
  0x4e   :  { %p884_p7 = scmp.ne.s32.totalorder %s74_s27, %s883_s21  ;;  %p889_p9 = scmp.lt.s32.totalorder %s883_s21, %s883_s21 }
  0x50   :  { %p890_p10 = por %p889_p9, %p888_p8 }
  0x52   :  { %p891_p11 = pnand %p890_p10, %p884_p7 }
  0x54   :  { %894 = shalt.err (!%p891_p11)
}
  0x55   :  { %79 = dma.hbm_to_vmem [thread:$0]  %s1128_s5, 512, %s74_s27, [#allocation9], %s950_s15, %s950_s15, %s951_s16  }
  0x56   :  { %s958_s24 = smov [#allocation11]   ;;  %s895_s30 = scalar_lea.hbm %s1129_s6, 512 }
  0x57   :  { %s85_s25 = sshll.u32 %s958_s24, 4  ;;  %p896_p12 = scmp.ne.s32.totalorder %s1129_s6, %s895_s30  ;;  %s86_s25 = int_to_ptr.vmem [resolvable:$true] %s85_s25 }
  0x58   :  { %p899_p13 = scmp.lt.u32.totalorder %s895_s30, %s1129_s6 }
  0x5a   :  { %p901_p0 = pnand %p899_p13, %p896_p12 }
  0x5c   :  { %904 = shalt.err (!%p901_p0)
}
  0x5d   :  { %s905_s11 = scalar_lea.vmem %s86_s25, 512  ;;  %p910_p2 = scmp.lt.s32.totalorder %s86_s25, %s86_s25 }
  0x5e   :  { %p906_p1 = scmp.ne.s32.totalorder %s86_s25, %s905_s11  ;;  %p911_p3 = scmp.lt.s32.totalorder %s905_s11, %s905_s11 }
  0x60   :  { %p912_p4 = por %p911_p3, %p910_p2 }
  0x62   :  { %p913_p5 = pnand %p912_p4, %p906_p1 }
  0x64   :  { %916 = shalt.err (!%p913_p5)
}
  0x65   :  { %91 = dma.hbm_to_vmem [thread:$0]  %s1129_s6, 512, %s86_s25, [#allocation12], %s950_s15, %s950_s15, %s951_s16  }
  0x66   :  { %939 = dma.done.wait [#allocation3], 128  }
  0x67   :  { %940 = vsyncadd [#allocation3], 4294967168 }
  0x68   :  { %941 = dma.done.wait [#allocation6], 768  }
  0x69   :  { %942 = vsyncadd [#allocation6], 4294966528 }
  0x6a   :  { %943 = dma.done.wait [#allocation9], 1024  }
  0x6b   :  { %944 = vsyncadd [#allocation9], 4294966272 }
  0x6c   :  { %945 = dma.done.wait [#allocation12], 512  }
  0x6d   :  { %946 = vsyncadd [#allocation12], 4294966784  ;;  %v116_v0 = vld [vmem:[#allocation7] sm:$0xff]  ;;  %v117_v1 = vld [vmem:[#allocation7 + $0x8] sm:$0xff]  ;;  %vm127_vm0 = vcmask 261120   ;;  %v959_v22 = vmov 0.0  }
  0x6e   :  { %v118_v2 = vld [vmem:[#allocation7 + $0x10] sm:$0xff]  ;;  %v740_v3 = vpack.c.bf16 %v117_v1, %v116_v0  ;;  %v119_v4 = vld [vmem:[#allocation7 + $0x18] sm:$0xff]  ;;  %v655_v5 = vld [vmem:[#allocation2] sm:$0xff]   ;;  %vm960_vm1 = vmmov 0   ;;  %vm298_vm2 = vcmask 64512   ;;  %s961_s12 = smov [#allocation13]  }
  0x6f   :  { %v211_v6 = vld [vmem:[#allocation8] sm:$0xff]  ;;  %v744_v7 = vpack.c.bf16 %v119_v4, %v118_v2  ;;  %v656_v8 = vunpack.c.l.bf16 %v655_v5  ;;  %v212_v9 = vld [vmem:[#allocation8 + $0x8] sm:$0xff]  ;;  %v657_v11 = vunpack.c.h.bf16 %v655_v5  ;;  %v213_v12 = vld [vmem:[#allocation8 + $0x10] sm:$0xff]  ;;  %s627_s13 = sshll.u32 %s961_s12, 4  ;;  %s628_s13 = int_to_ptr.vmem [resolvable:$true] %s627_s13 }
  0x70   :  { %741 = vmatprep.subr.bf16.mxu0 %v740_v3  ;;  %v748_v10 = vpack.c.bf16 %v212_v9, %v211_v6  ;;  %v214_v13 = vld [vmem:[#allocation8 + $0x18] sm:$0xff]  ;;  %v642_v15 = vld [vmem:[%s1126_s3] ss:$0 sm:$0xff]  ;;  %v445_v23 = vld [vmem:[#allocation10] sm:$0xff]  ;;  %s917_s14 = scalar_lea.vmem %s628_s13, 256  ;;  %p922_p7 = scmp.lt.s32.totalorder %s628_s13, %s628_s13 }
  0x71   :  { %743 = vmatpush3.bf16.msra.mxu0 %v740_v3  ;;  %694 = vmatprep.mubr.msk.f32.mxu0 %vm127_vm0, %v656_v8  ;;  %v752_v14 = vpack.c.bf16 %v214_v13, %v213_v12  ;;  %v446_v24 = vld [vmem:[#allocation10 + $0x8] sm:$0xff]  ;;  %v447_v25 = vld [vmem:[#allocation10 + $0x10] sm:$0xff]  ;;  %v448_v26 = vld [vmem:[#allocation10 + $0x18] sm:$0xff]  ;;  %p918_p6 = scmp.ne.s32.totalorder %s628_s13, %s917_s14  ;;  %p923_p8 = scmp.lt.s32.totalorder %s917_s14, %s917_s14 }
  0x72   :  { %745 = vmatprep.subr.bf16.mxu0 %v744_v7  ;;  %749 = vmatprep.subr.bf16.mxu1 %v748_v10  ;;  %v756_v27 = vpack.c.bf16 %v446_v24, %v445_v23  ;;  %v297_v28 = vld [vmem:[#allocation5 + $0x8] sm:$0xff]  ;;  %v296_v30 = vld [vmem:[#allocation5] sm:$0xff]  ;;  %v760_v32 = vpack.c.bf16 %v448_v26, %v447_v25  ;;  %v528_v33 = vld [vmem:[#allocation11] sm:$0xff] }
  0x73   :  { %751 = vmatpush3.bf16.msra.mxu1 %v748_v10  ;;  %v529_v34 = vld [vmem:[#allocation11 + $0x8] sm:$0xff]  ;;  %v530_v36 = vld [vmem:[#allocation11 + $0x10] sm:$0xff]  ;;  %v531_v37 = vld [vmem:[#allocation11 + $0x18] sm:$0xff]  ;;  %p924_p9 = por %p923_p8, %p922_p7 }
  0x74   :  { %753 = vmatprep.subr.bf16.mxu1 %v752_v14  ;;  %v764_v35 = vpack.c.bf16 %v529_v34, %v528_v33  ;;  %v768_v38 = vpack.c.bf16 %v531_v37, %v530_v36  ;;  %v651_v49 = vld [vmem:[%s1130_s7] ss:$0 sm:$0xff] }
  0x75   :  { %747 = vmatpush3.bf16.msra.mxu0 %v744_v7  ;;  %p925_p10 = pnand %p924_p9, %p918_p6 }
  0x76   :  { %708 = vmatprep.subr.mxu0 %v959_v22 }
  0x77   :  { %755 = vmatpush3.bf16.msra.mxu1 %v752_v14 }
  0x78   :  { %695 = vmatmul.mubr.msk.f32.vlgmr.msra.gmra.mrb[0].mxu0 %vm127_vm0, %v657_v11  ;;  %713 = vmatprep.subr.mxu1 %v959_v22 }
  0x79   :  { %710 = vmatprep.mubr.msk.f32.mxu0 %vm960_vm1, %v959_v22 }
 0x14b   :  { %v696_v16 = vpop.f32.mrb[0].mxu0 }
 0x14c   :  { %v206_v17 = vadd.f32 %v696_v16, %v642_v15  ;;  %v200_v18 = vpop.f32.mrb[1].mxu0 }
 0x14d   :  { %v201_v19 = vadd.f32 %v642_v15, %v200_v18 }
 0x14e   :  { %v210_v21 = vmax.f32 %v206_v17, 0.0 }
 0x14f   :  { %v209_v20 = vmax.f32 %v201_v19, 0.0 }
 0x151   :  { %705 = vmatprep.mubr.msk.f32.mxu1 %vm127_vm0, %v209_v20 }
 0x152   :  { %706 = vmatmul.mubr.msk.f32.vlgmr.msra.gmra.mrb[0].mxu1 %vm127_vm0, %v210_v21 }
 0x153   :  { %715 = vmatprep.mubr.msk.f32.mxu1 %vm960_vm1, %v959_v22 }
 0x225   :  { %v707_v29 = vpop.f32.mrb[0].mxu1 }
 0x226   :  { %v287_v31 = vpop.f32.mrb[1].mxu1  ;;  %714 = vmatpush3.msra.mxu1 %v707_v29 }
 0x227   :  { %709 = vmatpush3.msra.mxu0 %v287_v31  ;;  %716 = vmatmul.mubr.msk.f32.vlgmr.msra.gmra.mrb[2].mxu1 %vm298_vm2, %v297_v28 }
 0x228   :  { %711 = vmatmul.mubr.msk.f32.vlgmr.msra.gmra.mrb[2].mxu0 %vm298_vm2, %v296_v30  ;;  %757 = vmatprep.subr.bf16.mxu0 %v756_v27 }
 0x229   :  { %759 = vmatpush3.bf16.msra.mxu0 %v756_v27  ;;  %726 = vmatprep.mubr.msk.f32.mxu0 %vm127_vm0, %v209_v20 }
 0x22a   :  { %761 = vmatprep.subr.bf16.mxu0 %v760_v32  ;;  %765 = vmatprep.subr.bf16.mxu1 %v764_v35 }
 0x22b   :  { %767 = vmatpush3.bf16.msra.mxu1 %v764_v35 }
 0x22c   :  { %769 = vmatprep.subr.bf16.mxu1 %v768_v38 }
 0x22d   :  { %763 = vmatpush3.bf16.msra.mxu0 %v760_v32 }
 0x22f   :  { %771 = vmatpush3.bf16.msra.mxu1 %v768_v38 }
 0x230   :  { %727 = vmatmul.mubr.msk.f32.vlgmr.msra.gmra.mrb[4].mxu0 %vm127_vm0, %v210_v21 }
 0x2fa   :  { %v441_v39 = vpop.f32.mrb[2].mxu1 }
 0x2fb   :  { %v368_v40 = vpop.f32.mrb[2].mxu0  ;;  %v717_v41 = vpop.f32.mrb[3].mxu1 }
 0x2fc   :  { %v712_v42 = vpop.f32.mrb[3].mxu0 }
 0x303   :  { %v728_v43 = vpop.f32.mrb[4].mxu0 }
 0x304   :  { %v525_v44 = vadd.f32 %v728_v43, %v441_v39  ;;  %v515_v45 = vpop.f32.mrb[5].mxu0 }
 0x305   :  { %v524_v46 = vadd.f32 %v515_v45, %v368_v40 }
 0x306   :  { %v527_v48 = vmax.f32 %v525_v44, 0.0 }
 0x307   :  { %v526_v47 = vmax.f32 %v524_v46, 0.0 }
 0x309   :  { %737 = vmatprep.mubr.msk.f32.mxu1 %vm127_vm0, %v526_v47 }
 0x30a   :  { %738 = vmatmul.mubr.msk.f32.vlgmr.msra.gmra.mrb[4].mxu1 %vm127_vm0, %v527_v48 }
 0x3dd   :  { %v739_v50 = vpop.f32.mrb[4].mxu1 }
 0x3de   :  { %v617_v51 = vadd.f32 %v739_v50, %v651_v49  ;;  %v611_v52 = vpop.f32.mrb[5].mxu1 }
 0x3df   :  { %v612_v53 = vadd.f32 %v651_v49, %v611_v52 }
 0x3e0   :  { %621 = vst [vmem:[#allocation13 + $0x8] sm:$0xff] %v617_v51 }
 0x3e1   :  { %620 = vst [vmem:[#allocation13] sm:$0xff] %v612_v53 }
 0x3e2   :  { %928 = shalt.err (!%p925_p10)
}
 0x3e3   :  { %s929_s7 = scalar_lea.hbm %s1131_s8, 256 }
 0x3e4   :  { %p930_p11 = scmp.ne.s32.totalorder %s1131_s8, %s929_s7  ;;  %p933_p12 = scmp.lt.u32.totalorder %s929_s7, %s1131_s8 }
 0x3e6   :  { %p935_p13 = pnand %p933_p12, %p930_p11 }
 0x3e8   :  { %938 = shalt.err (!%p935_p13)
}
 0x3e9   :  { %633 = dma.vmem_to_hbm [thread:$0]  %s628_s13, 256, %s1131_s8, [#allocation4], %s950_s15, %s950_s15, %s951_s16  }
 0x3ea   :  { %947 = dma.done.wait [#allocation4], 256  }
 0x3eb   :  { %948 = vsyncadd [#allocation4], 4294967040 }
 0x3ec   :  { %637 = vsyncpa [#allocation3], 1 }
 0x3ed   :  { %638 = vsyncpa [#allocation6], 1 }
 0x3ee   :  { %639 = vsyncpa [#allocation9], 1 }
 0x3ef   :  { %640 = vsyncpa [#allocation12], 1 }
 0x3f0   :  { %641 = vsyncpa [#allocation4], 1 }

</bundles_post_ra>
